<compile_context>
chip_gen: v7x
topology: tpu7x:2x2x1
jax: 0.10.0
libtpu: 0.0.40
codegen_flags: <defaults>
</compile_context>

<pallas_src>
import math

import jax
import jax.numpy as jnp
from jax.experimental import pallas as pl
from jax.experimental.pallas import tpu as pltpu

# Sequences up to this length get a fully unrolled recurrence (static slices,
# full LLO visibility).  128 covers common HAR windows (UCI-HAR = 128 steps).
_FULL_UNROLL_T = 128


def _har_rnn_kernel(x_ref, w_ih_ref, w_hh_ref, b_h_ref, w_out_ref, b_out_ref,
                    out_ref):
    """Single-layer tanh RNN over the sequence + linear classifier head.

    x_ref:     (bb, T, D)  batch-major input block (VMEM)
    w_ih_ref:  (D, H)      input -> hidden weights (already transposed)
    w_hh_ref:  (H, H)      hidden -> hidden weights (already transposed)
    b_h_ref:   (1, H)      combined recurrent bias (b_ih + b_hh)
    w_out_ref: (H, C)      classifier weights (already transposed)
    b_out_ref: (1, C)      classifier bias
    out_ref:   (bb, C)     output logits block
    """
    bb, T, D = x_ref.shape
    H = w_hh_ref.shape[0]

    # Hoisted loads: one vld each, live across the whole recurrence.
    w_hh = w_hh_ref[...]          # (H, H)
    b_h = b_h_ref[...]            # (1, H)

    h = jnp.zeros((bb, H), jnp.float32)

    if T <= _FULL_UNROLL_T:
        # Hoisted input projection for the entire sequence (off the
        # h-dependency chain):  (bb*T, D) @ (D, H) + b_h  ->  (bb, T, H)
        x2 = x_ref[...].reshape(bb * T, D)
        xw = (jnp.dot(x2, w_ih_ref[...], preferred_element_type=jnp.float32)
              + b_h).reshape(bb, T, H)

        # Full static unroll: each serial step is one tiny MXU pass + add +
        # tanh (EUP).  Static slices only.
        for t in range(T):
            h = jnp.tanh(
                xw[:, t, :]
                + jnp.dot(h, w_hh, preferred_element_type=jnp.float32))
    else:
        # Long-sequence fallback: bounded program size.  Read the current
        # timestep directly from the VMEM input ref with a dynamic sublane
        # offset (pl.ds) instead of dynamically slicing a live value.
        w_ih = w_ih_ref[...]      # (D, H), hoisted load

        def step(t, h):
            x_t = x_ref[:, pl.ds(t, 1), :].reshape(bb, D)
            pre = (jnp.dot(x_t, w_ih, preferred_element_type=jnp.float32)
                   + jnp.dot(h, w_hh, preferred_element_type=jnp.float32)
                   + b_h)
            return jnp.tanh(pre)

        h = jax.lax.fori_loop(0, T, step, h, unroll=4)

    logits = (jnp.dot(h, w_out_ref[...], preferred_element_type=jnp.float32)
              + b_out_ref[...])
    out_ref[...] = logits.astype(out_ref.dtype)


@jax.jit
def har_forward(input_seq, w_ih, w_hh, b_h, w_out, b_out):
    """input_seq: (B, T, D) batch-major (PyTorch convention). Returns (B, C)."""
    B, T, D = input_seq.shape
    H = w_hh.shape[0]
    C = w_out.shape[1]

    # Grid over batch only (parallel): single step at toy batch sizes, shards
    # large batches across TensorCores (v7x megacore).
    bb = B if B <= 128 else 128
    grid = (pl.cdiv(B, bb),)

    cost = pl.CostEstimate(
        flops=2 * B * T * D * H + 2 * B * T * H * H + 2 * B * H * C,
        transcendentals=B * T * H,
        bytes_accessed=4 * (B * T * D + D * H + H * H + H + H * C + C + B * C),
    )

    return pl.pallas_call(
        _har_rnn_kernel,
        out_shape=jax.ShapeDtypeStruct((B, C), jnp.float32),
        grid=grid,
        in_specs=[
            pl.BlockSpec((bb, T, D), lambda i: (i, 0, 0)),   # x (batch-major)
            pl.BlockSpec((D, H), lambda i: (0, 0)),           # w_ih
            pl.BlockSpec((H, H), lambda i: (0, 0)),           # w_hh
            pl.BlockSpec((1, H), lambda i: (0, 0)),            # b_h
            pl.BlockSpec((H, C), lambda i: (0, 0)),            # w_out
            pl.BlockSpec((1, C), lambda i: (0, 0)),            # b_out
        ],
        out_specs=pl.BlockSpec((bb, C), lambda i: (i, 0)),
        compiler_params=pltpu.CompilerParams(
            dimension_semantics=("parallel",)),
        cost_estimate=cost,
    )(input_seq.astype(jnp.float32), w_ih, w_hh, b_h, w_out, b_out)


def init_params(input_size=6, hidden_size=30, num_classes=12, seed=0):
    """Deterministic init mirroring PyTorch's U(-1/sqrt(H), 1/sqrt(H))."""
    key = jax.random.PRNGKey(seed)
    k = jax.random.split(key, 6)
    bound = 1.0 / math.sqrt(hidden_size)
    w_ih = jax.random.uniform(k[0], (input_size, hidden_size), jnp.float32,
                              -bound, bound)
    w_hh = jax.random.uniform(k[1], (hidden_size, hidden_size), jnp.float32,
                              -bound, bound)
    b_ih = jax.random.uniform(k[2], (hidden_size,), jnp.float32, -bound, bound)
    b_hh = jax.random.uniform(k[3], (hidden_size,), jnp.float32, -bound, bound)
    w_out = jax.random.uniform(k[4], (hidden_size, num_classes), jnp.float32,
                               -bound, bound)
    b_out = jax.random.uniform(k[5], (num_classes,), jnp.float32, -bound, bound)
    # Combined recurrent bias (mathematically identical to PyTorch's b_ih+b_hh).
    b_h = (b_ih + b_hh).reshape(1, hidden_size)
    return w_ih, w_hh, b_h, w_out, b_out.reshape(1, num_classes)


def har_forward_ref(input_seq, w_ih, w_hh, b_h, w_out, b_out):
    """Pure-JAX reference of the same forward pass (correctness check)."""
    x = input_seq.astype(jnp.float32)
    B, T, D = x.shape
    H = w_hh.shape[0]

    def step(h, x_t):
        return jnp.tanh(x_t @ w_ih + h @ w_hh + b_h), None

    h0 = jnp.zeros((B, H), jnp.float32)
    h_last, _ = jax.lax.scan(step, h0, jnp.transpose(x, (1, 0, 2)))
    return h_last @ w_out + b_out


if __name__ == "__main__":
    # Shapes consistent with the module's forward contract:
    # (batch_size, seq_len, input_size) -> (batch_size, num_classes)
    batch, seq_len = 2, 8
    input_size, hidden_size, num_classes = 6, 30, 12

    key = jax.random.PRNGKey(0)
    x = jax.random.normal(key, (batch, seq_len, input_size), jnp.float32)

    params = init_params(input_size, hidden_size, num_classes, seed=0)

    logits = jax.block_until_ready(har_forward(x, *params))

    # Sanity check against the pure-JAX reference.
    ref = jax.block_until_ready(har_forward_ref(x, *params))
    assert logits.shape == (batch, num_classes)
    assert jnp.allclose(logits, ref, atol=1e-5, rtol=1e-5), (
        f"max abs err {jnp.max(jnp.abs(logits - ref))}")

    print("KERNEL_OK")
</pallas_src>

<mosaic_0001>
module attributes {stable_mosaic.version = 11 : i64} {
  func.func @_har_rnn_kernel(%arg0: i32, %arg1: memref<2x8x6xf32, #tpu.memory_space<vmem>>, %arg2: memref<6x30xf32, #tpu.memory_space<vmem>>, %arg3: memref<30x30xf32, #tpu.memory_space<vmem>>, %arg4: memref<1x30xf32, #tpu.memory_space<vmem>>, %arg5: memref<30x12xf32, #tpu.memory_space<vmem>>, %arg6: memref<1x12xf32, #tpu.memory_space<vmem>>, %arg7: memref<2x12xf32, #tpu.memory_space<vmem>>) attributes {dimension_semantics = [#tpu.dimension_semantics<parallel>], iteration_bounds = array<i64: 1>, scalar_prefetch = 0 : i64, scratch_operands = 0 : i64, tpu.core_type = #tpu.core_type<tc>, window_params = [{transform_indices = @transform_0, window_bounds = array<i64: 2, 8, 6>}, {pipeline_mode = #tpu.pipeline_mode<synchronous>, transform_indices = @transform_1, window_bounds = array<i64: 6, 30>}, {pipeline_mode = #tpu.pipeline_mode<synchronous>, transform_indices = @transform_2, window_bounds = array<i64: 30, 30>}, {pipeline_mode = #tpu.pipeline_mode<synchronous>, transform_indices = @transform_3, window_bounds = array<i64: 1, 30>}, {pipeline_mode = #tpu.pipeline_mode<synchronous>, transform_indices = @transform_4, window_bounds = array<i64: 30, 12>}, {pipeline_mode = #tpu.pipeline_mode<synchronous>, transform_indices = @transform_5, window_bounds = array<i64: 1, 12>}, {transform_indices = @transform_6, window_bounds = array<i64: 2, 12>}]} {
    %c0 = arith.constant 0 : index
    %c0_0 = arith.constant 0 : index
    %0 = vector.load %arg3[%c0, %c0_0] : memref<30x30xf32, #tpu.memory_space<vmem>>, vector<30x30xf32>
    %c0_1 = arith.constant 0 : index
    %c0_2 = arith.constant 0 : index
    %1 = vector.load %arg4[%c0_1, %c0_2] : memref<1x30xf32, #tpu.memory_space<vmem>>, vector<1x30xf32>
    %cst = arith.constant 0.000000e+00 : f32
    %2 = vector.broadcast %cst : f32 to vector<2x30xf32>
    %c0_3 = arith.constant 0 : index
    %c0_4 = arith.constant 0 : index
    %c0_5 = arith.constant 0 : index
    %3 = vector.load %arg1[%c0_3, %c0_4, %c0_5] : memref<2x8x6xf32, #tpu.memory_space<vmem>>, vector<2x8x6xf32>
    %4 = vector.shape_cast %3 : vector<2x8x6xf32> to vector<16x6xf32>
    %c0_6 = arith.constant 0 : index
    %c0_7 = arith.constant 0 : index
    %5 = vector.load %arg2[%c0_6, %c0_7] : memref<6x30xf32, #tpu.memory_space<vmem>>, vector<6x30xf32>
    %cst_8 = arith.constant dense<0.000000e+00> : vector<16x30xf32>
    %6 = tpu.matmul %4, %5, %cst_8 {dimension_numbers = #tpu.dot_dimension_numbers<[1], [0], [0], [1], [0, 0, 1, 1], [], []>} : vector<16x6xf32>, vector<6x30xf32>, vector<16x30xf32> -> vector<16x30xf32>
    %7 = vector.broadcast %1 : vector<1x30xf32> to vector<16x30xf32>
    %8 = arith.addf %6, %7 : vector<16x30xf32>
    %9 = vector.shape_cast %8 : vector<16x30xf32> to vector<2x8x30xf32>
    %10 = vector.extract_strided_slice %9 {offsets = [0, 0, 0], sizes = [2, 1, 30], strides = [1, 1, 1]} : vector<2x8x30xf32> to vector<2x1x30xf32>
    %11 = vector.shape_cast %10 : vector<2x1x30xf32> to vector<2x30xf32>
    %cst_9 = arith.constant dense<0.000000e+00> : vector<2x30xf32>
    %12 = tpu.matmul %2, %0, %cst_9 {dimension_numbers = #tpu.dot_dimension_numbers<[1], [0], [0], [1], [0, 0, 1, 1], [], []>} : vector<2x30xf32>, vector<30x30xf32>, vector<2x30xf32> -> vector<2x30xf32>
    %13 = arith.addf %11, %12 : vector<2x30xf32>
    %14 = math.tanh %13 : vector<2x30xf32>
    %15 = vector.extract_strided_slice %9 {offsets = [0, 1, 0], sizes = [2, 1, 30], strides = [1, 1, 1]} : vector<2x8x30xf32> to vector<2x1x30xf32>
    %16 = vector.shape_cast %15 : vector<2x1x30xf32> to vector<2x30xf32>
    %cst_10 = arith.constant dense<0.000000e+00> : vector<2x30xf32>
    %17 = tpu.matmul %14, %0, %cst_10 {dimension_numbers = #tpu.dot_dimension_numbers<[1], [0], [0], [1], [0, 0, 1, 1], [], []>} : vector<2x30xf32>, vector<30x30xf32>, vector<2x30xf32> -> vector<2x30xf32>
    %18 = arith.addf %16, %17 : vector<2x30xf32>
    %19 = math.tanh %18 : vector<2x30xf32>
    %20 = vector.extract_strided_slice %9 {offsets = [0, 2, 0], sizes = [2, 1, 30], strides = [1, 1, 1]} : vector<2x8x30xf32> to vector<2x1x30xf32>
    %21 = vector.shape_cast %20 : vector<2x1x30xf32> to vector<2x30xf32>
    %cst_11 = arith.constant dense<0.000000e+00> : vector<2x30xf32>
    %22 = tpu.matmul %19, %0, %cst_11 {dimension_numbers = #tpu.dot_dimension_numbers<[1], [0], [0], [1], [0, 0, 1, 1], [], []>} : vector<2x30xf32>, vector<30x30xf32>, vector<2x30xf32> -> vector<2x30xf32>
    %23 = arith.addf %21, %22 : vector<2x30xf32>
    %24 = math.tanh %23 : vector<2x30xf32>
    %25 = vector.extract_strided_slice %9 {offsets = [0, 3, 0], sizes = [2, 1, 30], strides = [1, 1, 1]} : vector<2x8x30xf32> to vector<2x1x30xf32>
    %26 = vector.shape_cast %25 : vector<2x1x30xf32> to vector<2x30xf32>
    %cst_12 = arith.constant dense<0.000000e+00> : vector<2x30xf32>
    %27 = tpu.matmul %24, %0, %cst_12 {dimension_numbers = #tpu.dot_dimension_numbers<[1], [0], [0], [1], [0, 0, 1, 1], [], []>} : vector<2x30xf32>, vector<30x30xf32>, vector<2x30xf32> -> vector<2x30xf32>
    %28 = arith.addf %26, %27 : vector<2x30xf32>
    %29 = math.tanh %28 : vector<2x30xf32>
    %30 = vector.extract_strided_slice %9 {offsets = [0, 4, 0], sizes = [2, 1, 30], strides = [1, 1, 1]} : vector<2x8x30xf32> to vector<2x1x30xf32>
    %31 = vector.shape_cast %30 : vector<2x1x30xf32> to vector<2x30xf32>
    %cst_13 = arith.constant dense<0.000000e+00> : vector<2x30xf32>
    %32 = tpu.matmul %29, %0, %cst_13 {dimension_numbers = #tpu.dot_dimension_numbers<[1], [0], [0], [1], [0, 0, 1, 1], [], []>} : vector<2x30xf32>, vector<30x30xf32>, vector<2x30xf32> -> vector<2x30xf32>
    %33 = arith.addf %31, %32 : vector<2x30xf32>
    %34 = math.tanh %33 : vector<2x30xf32>
    %35 = vector.extract_strided_slice %9 {offsets = [0, 5, 0], sizes = [2, 1, 30], strides = [1, 1, 1]} : vector<2x8x30xf32> to vector<2x1x30xf32>
    %36 = vector.shape_cast %35 : vector<2x1x30xf32> to vector<2x30xf32>
    %cst_14 = arith.constant dense<0.000000e+00> : vector<2x30xf32>
    %37 = tpu.matmul %34, %0, %cst_14 {dimension_numbers = #tpu.dot_dimension_numbers<[1], [0], [0], [1], [0, 0, 1, 1], [], []>} : vector<2x30xf32>, vector<30x30xf32>, vector<2x30xf32> -> vector<2x30xf32>
    %38 = arith.addf %36, %37 : vector<2x30xf32>
    %39 = math.tanh %38 : vector<2x30xf32>
    %40 = vector.extract_strided_slice %9 {offsets = [0, 6, 0], sizes = [2, 1, 30], strides = [1, 1, 1]} : vector<2x8x30xf32> to vector<2x1x30xf32>
    %41 = vector.shape_cast %40 : vector<2x1x30xf32> to vector<2x30xf32>
    %cst_15 = arith.constant dense<0.000000e+00> : vector<2x30xf32>
    %42 = tpu.matmul %39, %0, %cst_15 {dimension_numbers = #tpu.dot_dimension_numbers<[1], [0], [0], [1], [0, 0, 1, 1], [], []>} : vector<2x30xf32>, vector<30x30xf32>, vector<2x30xf32> -> vector<2x30xf32>
    %43 = arith.addf %41, %42 : vector<2x30xf32>
    %44 = math.tanh %43 : vector<2x30xf32>
    %45 = vector.extract_strided_slice %9 {offsets = [0, 7, 0], sizes = [2, 1, 30], strides = [1, 1, 1]} : vector<2x8x30xf32> to vector<2x1x30xf32>
    %46 = vector.shape_cast %45 : vector<2x1x30xf32> to vector<2x30xf32>
    %cst_16 = arith.constant dense<0.000000e+00> : vector<2x30xf32>
    %47 = tpu.matmul %44, %0, %cst_16 {dimension_numbers = #tpu.dot_dimension_numbers<[1], [0], [0], [1], [0, 0, 1, 1], [], []>} : vector<2x30xf32>, vector<30x30xf32>, vector<2x30xf32> -> vector<2x30xf32>
    %48 = arith.addf %46, %47 : vector<2x30xf32>
    %49 = math.tanh %48 : vector<2x30xf32>
    %c0_17 = arith.constant 0 : index
    %c0_18 = arith.constant 0 : index
    %50 = vector.load %arg5[%c0_17, %c0_18] : memref<30x12xf32, #tpu.memory_space<vmem>>, vector<30x12xf32>
    %cst_19 = arith.constant dense<0.000000e+00> : vector<2x12xf32>
    %51 = tpu.matmul %49, %50, %cst_19 {dimension_numbers = #tpu.dot_dimension_numbers<[1], [0], [0], [1], [0, 0, 1, 1], [], []>} : vector<2x30xf32>, vector<30x12xf32>, vector<2x12xf32> -> vector<2x12xf32>
    %c0_20 = arith.constant 0 : index
    %c0_21 = arith.constant 0 : index
    %52 = vector.load %arg6[%c0_20, %c0_21] : memref<1x12xf32, #tpu.memory_space<vmem>>, vector<1x12xf32>
    %53 = vector.broadcast %52 : vector<1x12xf32> to vector<2x12xf32>
    %54 = arith.addf %51, %53 : vector<2x12xf32>
    %c0_22 = arith.constant 0 : index
    %c0_23 = arith.constant 0 : index
    %55 = vector.load %arg7[%c0_22, %c0_23] : memref<2x12xf32, #tpu.memory_space<vmem>>, vector<2x12xf32>
    tpu.vector_store %arg7[%c0_22, %c0_23], %54 {strides = array<i32>} : memref<2x12xf32, #tpu.memory_space<vmem>>, vector<2x12xf32>,
    return
  }
  func.func @transform_0(%arg0: i32) -> (i32, i32, i32) {
    %c0_i32 = arith.constant 0 : i32
    %c0_i32_0 = arith.constant 0 : i32
    %c0_i32_1 = arith.constant 0 : i32
    return %arg0, %c0_i32, %c0_i32_0 : i32, i32, i32
  }
  func.func @transform_1(%arg0: i32) -> (i32, i32) {
    %c0_i32 = arith.constant 0 : i32
    %c0_i32_0 = arith.constant 0 : i32
    %c0_i32_1 = arith.constant 0 : i32
    return %c0_i32, %c0_i32_0 : i32, i32
  }
  func.func @transform_2(%arg0: i32) -> (i32, i32) {
    %c0_i32 = arith.constant 0 : i32
    %c0_i32_0 = arith.constant 0 : i32
    %c0_i32_1 = arith.constant 0 : i32
    return %c0_i32, %c0_i32_0 : i32, i32
  }
  func.func @transform_3(%arg0: i32) -> (i32, i32) {
    %c0_i32 = arith.constant 0 : i32
    %c0_i32_0 = arith.constant 0 : i32
    %c0_i32_1 = arith.constant 0 : i32
    return %c0_i32, %c0_i32_0 : i32, i32
  }
  func.func @transform_4(%arg0: i32) -> (i32, i32) {
    %c0_i32 = arith.constant 0 : i32
    %c0_i32_0 = arith.constant 0 : i32
    %c0_i32_1 = arith.constant 0 : i32
    return %c0_i32, %c0_i32_0 : i32, i32
  }
  func.func @transform_5(%arg0: i32) -> (i32, i32) {
    %c0_i32 = arith.constant 0 : i32
    %c0_i32_0 = arith.constant 0 : i32
    %c0_i32_1 = arith.constant 0 : i32
    return %c0_i32, %c0_i32_0 : i32, i32
  }
  func.func @transform_6(%arg0: i32) -> (i32, i32) {
    %c0_i32 = arith.constant 0 : i32
    %c0_i32_0 = arith.constant 0 : i32
    return %arg0, %c0_i32 : i32, i32
  }
}

</mosaic_0001>

<bundles_post_ra>
// kernel: har_forward.1
= control target key start
LH: loop header
LB: loop body
LE: loop exit
PB: predicated region body
PF: predicated region fallthrough
CT: control target
= control target key end

     0   :  { %vm45_vm0 = vcmask 1045504   ;;  %v1214_v3 = vmov 0.0|0.0   ;;  %vm38_vm1 = vcmask 48128   ;;  %s1423_s0 = inlined_call_operand.vmem [shape: f32[2,8,6], index: 0, kind: input, shape index: {}]   ;;  %s1424_s1 = inlined_call_operand.vmem [shape: f32[6,30], index: 1, kind: input, shape index: {}]   ;;  %s1425_s2 = inlined_call_operand.vmem [shape: f32[30,30], index: 2, kind: input, shape index: {}]   ;;  %s1426_s3 = inlined_call_operand.vmem [shape: f32[1,30], index: 3, kind: input, shape index: {}]   ;;  %s1427_s4 = inlined_call_operand.vmem [shape: f32[30,12], index: 4, kind: input, shape index: {}]   ;;  %s1428_s5 = inlined_call_operand.vmem [shape: f32[1,12], index: 5, kind: input, shape index: {}]   ;;  %s1429_s6 = inlined_call_operand.hbm [shape: f32[2,12], index: 6, kind: output, shape index: {}]  }
   0x1   :  { %v24_v0 = vld [vmem:[%s1425_s2] sm:$0xff]  ;;  %v25_v1 = vld [vmem:[%s1425_s2 + $0x8] sm:$0xff]  ;;  %1090 = vmatprep.subr.bf16.mxu1 %v1214_v3  ;;  %v26_v7 = vld [vmem:[%s1425_s2 + $0x10] sm:$0xff] }
   0x2   :  { %v31_v2 = vld [vmem:[%s1424_s1] sm:$0x3f]  ;;  %v1264_v4 = vpack.c.bf16 %v25_v1, %v24_v0  ;;  %v30_v6 = vld [vmem:[%s1423_s0 + $0x8] sm:$0xff]  ;;  %v27_v8 = vld [vmem:[%s1425_s2 + $0x18] sm:$0x3f] }
   0x3   :  { %986 = vmatprep.subr.msk.mxu0 %vm45_vm0, %v31_v2  ;;  %v29_v5 = vld [vmem:[%s1423_s0] sm:$0xff]  ;;  %v1281_v9 = vpack.c.bf16 %v27_v8, %v26_v7 }
   0x4   :  { %987 = vmatpush3.msk.msra.mxu0 %vm45_vm0, %v31_v2  ;;  %988 = vmatprep.mubr.msk.f32.mxu0 %vm38_vm1, %v29_v5 }
   0x5   :  { %1092 = vmatpush3.bf16.msra.mxu1 %v1264_v4  ;;  %989 = vmatmul.mubr.msk.f32.vlgmr.msra.gmra.mrb[0].mxu0 %vm38_vm1, %v30_v6 }
   0x6   :  { %11 = vsyncpa [#allocation3], 0  ;;  %vm1215_vm2 = vmmov 1   ;;  %1093 = vmatprep.subr.bf16.mxu1 %v1214_v3  ;;  %vm1216_vm4 = vmmov 0   ;;  %v1217_v11 = vmov 0.0   ;;  %1097 = vmatprep.subr.bf16.mxu0 %v1214_v3  ;;  %vm212_vm5 = vcmask 1041409  }
   0x7   :  { %vm1284_vm3 = vmpackc.low %vm45_vm0, %vm1215_vm2  ;;  %999 = vmatprep.mubr.msk.f32.mxu1 %vm1216_vm4, %v1217_v11  ;;  %1010 = vmatprep.mubr.msk.f32.mxu0 %vm1216_vm4, %v1217_v11  ;;  %v916_v14 = vld [vmem:[%s1426_s3] ss:$0 sm:$0xff]  ;;  %vm124_vm6 = vcmask 244736   ;;  %s1218_s18 = smov [#allocation2]   ;;  %vm900_vm7 = vcmask 91136  }
   0x8   :  { %1099 = vmatpush3.bf16.msra.mxu0 %v1264_v4  ;;  %v935_v10 = vld [vmem:[%s1428_s5] ss:$0 sm:$0xff]  ;;  %s908_s19 = sshll.u32 %s1218_s18, 4  ;;  %s909_s19 = int_to_ptr.vmem [resolvable:$true] %s908_s19 }
   0x9   :  { %1096 = vmatpush3.bf16.msk.msra.mxu1 %vm1284_vm3, %v1281_v9  ;;  %1100 = vmatprep.subr.bf16.mxu0 %v1214_v3  ;;  %s1190_s20 = scalar_lea.vmem %s909_s19, 32  ;;  %p1195_p1 = scmp.lt.s32.totalorder %s909_s19, %s909_s19 }
   0xa   :  { %1104 = vmatprep.subr.bf16.mxu1 %v1214_v3  ;;  %p1191_p0 = scmp.ne.s32.totalorder %s909_s19, %s1190_s20  ;;  %p1196_p2 = scmp.lt.s32.totalorder %s1190_s20, %s1190_s20 }
   0xc   :  { %1000 = vmatmul.mubr.f32.vlgmr.msra.gmra.mrb[0].mxu1 %v1217_v11  ;;  %1103 = vmatpush3.bf16.msk.msra.mxu0 %vm1284_vm3, %v1281_v9  ;;  %p1197_p3 = por %p1196_p2, %p1195_p1 }
   0xd   :  { %1106 = vmatpush3.bf16.msra.mxu1 %v1264_v4  ;;  %1021 = vmatprep.mubr.msk.f32.mxu1 %vm1216_vm4, %v1217_v11 }
   0xe   :  { %1107 = vmatprep.subr.bf16.mxu1 %v1214_v3  ;;  %1111 = vmatprep.subr.bf16.mxu0 %v1214_v3  ;;  %p1198_p4 = pnand %p1197_p3, %p1191_p0 }
  0x11   :  { %1110 = vmatpush3.bf16.msk.msra.mxu1 %vm1284_vm3, %v1281_v9 }
  0x12   :  { %1118 = vmatprep.subr.bf16.mxu1 %v1214_v3 }
  0xd8   :  { %v990_v12 = vpop.f32.mrb[0].mxu0 }
  0xd9   :  { %v115_v13 = vpop.f32.mrb[1].mxu0  ;;  %v1316_v15 = vadd.f32 %v990_v12, %v916_v14 }
  0xda   :  { %v1318_v16 = vadd.f32 %v916_v14, %v115_v13 }
  0xdf   :  { %v197_v17 = vpop.f32.mrb[0].mxu1 }
  0xe0   :  { %v202_v18 = vrot.slane %v197_v17, 1  ;;  %v1001_v19 = vpop.f32.mrb[1].mxu1  ;;  %v205_v20 = vadd.f32 %v197_v17, %v1318_v16 }
  0xe2   :  { %v206_v21 = vadd.f32 %v202_v18, %v1316_v15 }
  0xe4   :  { %1158 = vtanh.f32 %v206_v21 }
  0xe5   :  { %1160 = vtanh.f32 %v205_v20 }
  0xee   :  { %v1159_v22 = vpop.eup %1158 }
  0xef   :  { %v211_v23 = vrot.slane %v1159_v22, 7  ;;  %v1161_v24 = vpop.eup %1160 }
  0xf1   :  { %v213_v25 = vsel %vm212_vm5, %v211_v23, %v1161_v24 }
  0xf2   :  { %1011 = vmatmul.mubr.msk.f32.vlgmr.msra.gmra.mrb[2].mxu0 %vm124_vm6, %v213_v25 }
  0xf3   :  { %1113 = vmatpush3.bf16.msra.mxu0 %v1264_v4  ;;  %1032 = vmatprep.mubr.msk.f32.mxu0 %vm1216_vm4, %v1217_v11 }
  0xf4   :  { %1114 = vmatprep.subr.bf16.mxu0 %v1214_v3 }
  0xf7   :  { %1117 = vmatpush3.bf16.msk.msra.mxu0 %vm1284_vm3, %v1281_v9 }
  0xf8   :  { %1125 = vmatprep.subr.bf16.mxu0 %v1214_v3 }
 0x1c5   :  { %v282_v26 = vpop.f32.mrb[2].mxu0 }
 0x1c6   :  { %v287_v27 = vrot.slane %v282_v26, 7  ;;  %v1012_v28 = vpop.f32.mrb[3].mxu0  ;;  %v291_v30 = vadd.f32 %v282_v26, %v1316_v15 }
 0x1c8   :  { %v290_v29 = vadd.f32 %v287_v27, %v1318_v16 }
 0x1ca   :  { %1162 = vtanh.f32 %v290_v29 }
 0x1cb   :  { %1164 = vtanh.f32 %v291_v30 }
 0x1d4   :  { %v1163_v31 = vpop.eup %1162 }
 0x1d5   :  { %v296_v32 = vrot.slane %v1163_v31, 1  ;;  %v1165_v33 = vpop.eup %1164  ;;  %v810_v31 = vld [vmem:[%s1427_s4 + $0x8] sm:$0xff] }
 0x1d7   :  { %v297_v34 = vsel %vm212_vm5, %v1165_v33, %v296_v32  ;;  %v811_v33 = vld [vmem:[%s1427_s4 + $0x10] sm:$0xff] }
 0x1d8   :  { %1022 = vmatmul.mubr.msk.f32.vlgmr.msra.gmra.mrb[2].mxu1 %vm124_vm6, %v297_v34  ;;  %v812_v34 = vld [vmem:[%s1427_s4 + $0x18] sm:$0x3f] }
 0x1d9   :  { %1120 = vmatpush3.bf16.msra.mxu1 %v1264_v4  ;;  %1043 = vmatprep.mubr.msk.f32.mxu1 %vm1216_vm4, %v1217_v11 }
 0x1da   :  { %1121 = vmatprep.subr.bf16.mxu1 %v1214_v3 }
 0x1dd   :  { %1124 = vmatpush3.bf16.msk.msra.mxu1 %vm1284_vm3, %v1281_v9 }
 0x1de   :  { %1132 = vmatprep.subr.bf16.mxu1 %v1214_v3 }
 0x2ab   :  { %v366_v35 = vpop.f32.mrb[2].mxu1 }
 0x2ac   :  { %v371_v36 = vrot.slane %v366_v35, 6  ;;  %v372_v37 = vrot.slane %v366_v35, 7  ;;  %v1023_v38 = vpop.f32.mrb[3].mxu1  ;;  %v1150_v35 = vpack.c.bf16 %v812_v34, %v811_v33 }
 0x2ae   :  { %v375_v39 = vadd.f32 %v371_v36, %v1318_v16  ;;  %v376_v40 = vadd.f32 %v372_v37, %v1316_v15 }
 0x2b0   :  { %1166 = vtanh.f32 %v375_v39 }
 0x2b1   :  { %1168 = vtanh.f32 %v376_v40 }
 0x2ba   :  { %v1167_v41 = vpop.eup %1166 }
 0x2bb   :  { %v1169_v42 = vpop.eup %1168  ;;  %v381_v43 = vrot.slane %v1167_v41, 2 }
 0x2bc   :  { %v382_v44 = vrot.slane %v1169_v42, 1 }
 0x2be   :  { %v383_v45 = vsel %vm212_vm5, %v382_v44, %v381_v43 }
 0x2bf   :  { %1033 = vmatmul.mubr.msk.f32.vlgmr.msra.gmra.mrb[4].mxu0 %vm124_vm6, %v383_v45 }
 0x2c0   :  { %1127 = vmatpush3.bf16.msra.mxu0 %v1264_v4  ;;  %1054 = vmatprep.mubr.msk.f32.mxu0 %vm1216_vm4, %v1217_v11 }
 0x2c1   :  { %1128 = vmatprep.subr.bf16.mxu0 %v1214_v3 }
 0x2c4   :  { %1131 = vmatpush3.bf16.msk.msra.mxu0 %vm1284_vm3, %v1281_v9 }
 0x2c5   :  { %1139 = vmatprep.subr.bf16.mxu0 %v1214_v3 }
 0x392   :  { %v452_v46 = vpop.f32.mrb[4].mxu0 }
 0x393   :  { %v457_v47 = vrot.slane %v452_v46, 5  ;;  %v458_v48 = vrot.slane %v452_v46, 6  ;;  %v1034_v49 = vpop.f32.mrb[5].mxu0 }
 0x395   :  { %v461_v50 = vadd.f32 %v457_v47, %v1318_v16  ;;  %v462_v51 = vadd.f32 %v458_v48, %v1316_v15 }
 0x397   :  { %1170 = vtanh.f32 %v461_v50 }
 0x398   :  { %1172 = vtanh.f32 %v462_v51 }
 0x3a1   :  { %v1171_v52 = vpop.eup %1170 }
 0x3a2   :  { %v1173_v53 = vpop.eup %1172  ;;  %v467_v54 = vrot.slane %v1171_v52, 3 }
 0x3a3   :  { %v468_v55 = vrot.slane %v1173_v53, 2 }
 0x3a5   :  { %v469_v56 = vsel %vm212_vm5, %v468_v55, %v467_v54 }
 0x3a6   :  { %1044 = vmatmul.mubr.msk.f32.vlgmr.msra.gmra.mrb[4].mxu1 %vm124_vm6, %v469_v56 }
 0x3a7   :  { %1134 = vmatpush3.bf16.msra.mxu1 %v1264_v4  ;;  %1065 = vmatprep.mubr.msk.f32.mxu1 %vm1216_vm4, %v1217_v11 }
 0x3a8   :  { %1135 = vmatprep.subr.bf16.mxu1 %v1214_v3 }
 0x3ab   :  { %1138 = vmatpush3.bf16.msk.msra.mxu1 %vm1284_vm3, %v1281_v9 }
 0x3ac   :  { %1146 = vmatprep.subr.bf16.mxu1 %v1214_v3 }
 0x479   :  { %v538_v57 = vpop.f32.mrb[4].mxu1 }
 0x47a   :  { %v543_v58 = vrot.slane %v538_v57, 4  ;;  %v544_v59 = vrot.slane %v538_v57, 5  ;;  %v1045_v60 = vpop.f32.mrb[5].mxu1 }
 0x47c   :  { %v547_v61 = vadd.f32 %v543_v58, %v1318_v16  ;;  %v548_v62 = vadd.f32 %v544_v59, %v1316_v15 }
 0x47e   :  { %1174 = vtanh.f32 %v547_v61 }
 0x47f   :  { %1176 = vtanh.f32 %v548_v62 }
 0x488   :  { %v1175_v63 = vpop.eup %1174 }
 0x489   :  { %v1177_v0 = vpop.eup %1176  ;;  %v553_v1 = vrot.slane %v1175_v63, 4 }
 0x48a   :  { %v554_v2 = vrot.slane %v1177_v0, 3 }
 0x48c   :  { %v555_v5 = vsel %vm212_vm5, %v554_v2, %v553_v1 }
 0x48d   :  { %1055 = vmatmul.mubr.msk.f32.vlgmr.msra.gmra.mrb[6].mxu0 %vm124_vm6, %v555_v5 }
 0x48e   :  { %1141 = vmatpush3.bf16.msra.mxu0 %v1264_v4  ;;  %1076 = vmatprep.mubr.msk.f32.mxu0 %vm1216_vm4, %v1217_v11 }
 0x48f   :  { %1142 = vmatprep.subr.bf16.mxu0 %v1214_v3 }
 0x492   :  { %1145 = vmatpush3.bf16.msk.msra.mxu0 %vm1284_vm3, %v1281_v9 }
 0x560   :  { %v624_v6 = vpop.f32.mrb[6].mxu0 }
 0x561   :  { %v629_v7 = vrot.slane %v624_v6, 3  ;;  %v630_v8 = vrot.slane %v624_v6, 4  ;;  %v1056_v12 = vpop.f32.mrb[7].mxu0 }
 0x563   :  { %v633_v13 = vadd.f32 %v629_v7, %v1318_v16  ;;  %v634_v14 = vadd.f32 %v630_v8, %v1316_v15 }
 0x565   :  { %1178 = vtanh.f32 %v633_v13 }
 0x566   :  { %1180 = vtanh.f32 %v634_v14 }
 0x56f   :  { %v1179_v4 = vpop.eup %1178 }
 0x570   :  { %v1181_v17 = vpop.eup %1180  ;;  %v639_v18 = vrot.slane %v1179_v4, 5 }
 0x571   :  { %v640_v19 = vrot.slane %v1181_v17, 4 }
 0x573   :  { %v641_v20 = vsel %vm212_vm5, %v640_v19, %v639_v18 }
 0x574   :  { %1066 = vmatmul.mubr.msk.f32.vlgmr.msra.gmra.mrb[6].mxu1 %vm124_vm6, %v641_v20 }
 0x575   :  { %1087 = vmatprep.mubr.msk.f32.mxu1 %vm1216_vm4, %v1217_v11  ;;  %v809_v11 = vld [vmem:[%s1427_s4] sm:$0xff] }
 0x576   :  { %v1147_v32 = vpack.c.bf16 %v810_v31, %v809_v11 }
 0x578   :  { %1148 = vmatpush3.bf16.msra.mxu1 %v1147_v32 }
 0x579   :  { %1149 = vmatprep.subr.bf16.mxu1 %v1214_v3 }
 0x57c   :  { %1152 = vmatpush3.bf16.msk.msra.mxu1 %vm1284_vm3, %v1150_v35 }
 0x647   :  { %v710_v9 = vpop.f32.mrb[6].mxu1 }
 0x648   :  { %v715_v21 = vrot.slane %v710_v9, 2  ;;  %v716_v22 = vrot.slane %v710_v9, 3  ;;  %v1067_v23 = vpop.f32.mrb[7].mxu1 }
 0x64a   :  { %v719_v24 = vadd.f32 %v715_v21, %v1318_v16  ;;  %v720_v25 = vadd.f32 %v716_v22, %v1316_v15 }
 0x64c   :  { %1182 = vtanh.f32 %v719_v24 }
 0x64d   :  { %1184 = vtanh.f32 %v720_v25 }
 0x656   :  { %v1183_v26 = vpop.eup %1182 }
 0x657   :  { %v1185_v27 = vpop.eup %1184  ;;  %v725_v28 = vrot.slane %v1183_v26, 6 }
 0x658   :  { %v726_v29 = vrot.slane %v1185_v27, 5 }
 0x65a   :  { %v727_v30 = vsel %vm212_vm5, %v726_v29, %v725_v28 }
 0x65b   :  { %1077 = vmatmul.mubr.msk.f32.vlgmr.msra.gmra.mrb[8].mxu0 %vm124_vm6, %v727_v30 }
 0x72e   :  { %v796_v36 = vpop.f32.mrb[8].mxu0 }
 0x72f   :  { %v801_v37 = vrot.slane %v796_v36, 1  ;;  %v802_v38 = vrot.slane %v796_v36, 2  ;;  %v1078_v39 = vpop.f32.mrb[9].mxu0 }
 0x731   :  { %v805_v40 = vadd.f32 %v801_v37, %v1318_v16  ;;  %v806_v3 = vadd.f32 %v802_v38, %v1316_v15 }
 0x733   :  { %1186 = vtanh.f32 %v805_v40 }
 0x734   :  { %1188 = vtanh.f32 %v806_v3 }
 0x73d   :  { %v1187_v41 = vpop.eup %1186 }
 0x73e   :  { %v1189_v42 = vpop.eup %1188  ;;  %v822_v43 = vrot.slane %v1187_v41, 7 }
 0x73f   :  { %v823_v44 = vrot.slane %v1189_v42, 6 }
 0x741   :  { %v824_v45 = vsel %vm212_vm5, %v823_v44, %v822_v43 }
 0x742   :  { %1088 = vmatmul.mubr.msk.f32.vlgmr.msra.gmra.mrb[8].mxu1 %vm124_vm6, %v824_v45 }
 0x815   :  { %v896_v46 = vpop.f32.mrb[8].mxu1 }
 0x816   :  { %v897_v16 = vadd.f32 %v935_v10, %v896_v46  ;;  %v1089_v15 = vpop.f32.mrb[9].mxu1 }
 0x818   :  { %901 = vst.msk [vmem:[#allocation2] sm:$0x3] %vm900_vm7, %v897_v16 }
 0x819   :  { %1201 = shalt.err (!%p1198_p4)
}
 0x81a   :  { %s1202_s23 = scalar_lea.hbm %s1429_s6, 32 }
 0x81b   :  { %p1203_p5 = scmp.ne.s32.totalorder %s1429_s6, %s1202_s23  ;;  %p1206_p6 = scmp.lt.u32.totalorder %s1202_s23, %s1429_s6 }
 0x81d   :  { %p1208_p7 = pnand %p1206_p6, %p1203_p5 }
 0x81f   :  { %1211 = shalt.err (!%p1208_p7)
}
 0x820   :  { %911 = dma.vmem_to_hbm [thread:$0]  %s909_s19, 32, %s1429_s6, [#allocation3]  }
 0x821   :  { %1212 = dma.done.wait [#allocation3], 32  }
 0x822   :  { %1213 = vsyncadd [#allocation3], 4294967264 }
 0x823   :  { %915 = vsyncpa [#allocation3], 1 }

</bundles_post_ra>
